<compile_context>
chip_gen: v5e
topology: v5e:2x2
jax: 0.10.0
libtpu: 0.0.40
codegen_flags: <defaults>
</compile_context>

<pallas_src>
import functools

import jax
import jax.numpy as jnp
from jax.experimental import pallas as pl
from jax.experimental.pallas import tpu as pltpu

EPS = 1e-5


# ----------------------------------------------------------------------------
# Kernels
# ----------------------------------------------------------------------------
def _ibnorm_kernel(x_ref, gamma_ref, beta_ref, o_ref, *, bn_channels, with_relu):
    """Single-pass fused IBNorm (+ optional ReLU) over a (N, c_tile, HW) block."""
    x = x_ref[...]
    n, c_tile, hw = x.shape
    xf = x.astype(jnp.float32)

    # One read of x: per-(n, c) sum and sum-of-squares over the spatial axis.
    # NOTE: var = E[x^2] - mean^2 in f32 (clamped at 0). Fine for post-conv
    # activations; would need shifted/Welford sums for large-|mean| inputs.
    s1 = jnp.sum(xf, axis=2, keepdims=True)            # (N, c_tile, 1)
    s2 = jnp.sum(xf * xf, axis=2, keepdims=True)       # (N, c_tile, 1)

    inv_hw = jnp.float32(1.0 / hw)
    inv_nhw = jnp.float32(1.0 / (n * hw))

    # InstanceNorm stats (per n, c); biased variance.
    mean_in = s1 * inv_hw
    var_in = jnp.maximum(s2 * inv_hw - mean_in * mean_in, 0.0)
    scale_in = jax.lax.rsqrt(var_in + EPS)              # EUP path
    shift_in = -mean_in * scale_in

    # BatchNorm stats (per c, reduced over N too); affine folded into scale/shift.
    sum_bn = jnp.sum(s1, axis=0, keepdims=True)         # (1, c_tile, 1)
    sumsq_bn = jnp.sum(s2, axis=0, keepdims=True)
    mean_bn = sum_bn * inv_nhw
    var_bn = jnp.maximum(sumsq_bn * inv_nhw - mean_bn * mean_bn, 0.0)
    gamma = gamma_ref[...][None]                         # (1, c_tile, 1)
    beta = beta_ref[...][None]
    scale_bn = jax.lax.rsqrt(var_bn + EPS) * gamma
    shift_bn = beta - mean_bn * scale_bn

    # Per-channel BN-vs-IN select on the tiny (N, c_tile, 1) tensors only
    # (handles a BN/IN boundary falling inside a tile).
    c0 = pl.program_id(0) * c_tile
    c_idx = jax.lax.broadcasted_iota(jnp.int32, (1, c_tile, 1), 1) + c0
    is_bn = c_idx < bn_channels
    scale = jnp.where(is_bn, scale_bn, scale_in)          # (N, c_tile, 1)
    shift = jnp.where(is_bn, shift_bn, shift_in)

    y = xf * scale + shift
    if with_relu:                                        # fused Conv2dIBNormRelu ReLU
        y = jnp.maximum(y, 0.0)
    o_ref[...] = y.astype(o_ref.dtype)                   # single lane-dense store


def _stats_kernel(x_ref, s1_ref, s2_ref):
    """Two-pass path, pass 1: accumulate per-(n, c) sum / sum-of-squares over
    HW tiles. HW is the last grid axis ('arbitrary'); outputs are resident
    accumulators initialized via pl.when."""
    @pl.when(pl.program_id(1) == 0)
    def _():
        s1_ref[...] = jnp.zeros_like(s1_ref)
        s2_ref[...] = jnp.zeros_like(s2_ref)

    xf = x_ref[...].astype(jnp.float32)
    s1_ref[...] += jnp.sum(xf, axis=2, keepdims=True)
    s2_ref[...] += jnp.sum(xf * xf, axis=2, keepdims=True)


def _normalize_kernel(x_ref, scale_ref, shift_ref, o_ref, *, with_relu):
    """Two-pass path, pass 2: y = x*scale + shift (+ ReLU), fully tiled."""
    y = x_ref[...].astype(jnp.float32) * scale_ref[...] + shift_ref[...]
    if with_relu:
        y = jnp.maximum(y, 0.0)
    o_ref[...] = y.astype(o_ref.dtype)


# ----------------------------------------------------------------------------
# Tiling / VMEM heuristics
# ----------------------------------------------------------------------------
def _vmem_capacity_bytes():
    """Best-effort per-TensorCore VMEM capacity (v5e/v6e: 128 MiB, v7x: 64 MiB)."""
    cap = None
    try:
        info = pltpu.get_tpu_info()
        cap = getattr(info, "vmem_capacity_bytes", None)
    except Exception:
        cap = None
    if not cap:
        cap = 64 << 20  # conservative default
    try:
        kind = jax.devices()[0].device_kind.lower()
        if "v7" in kind:
            cap = min(int(cap), 64 << 20)  # per-TC VMEM even if per-chip reported
    except Exception:
        pass
    return int(min(int(cap), 128 << 20))


def _num_tensorcores():
    try:
        kind = jax.devices()[0].device_kind.lower()
        if "v7" in kind:
            return 2
    except Exception:
        pass
    return 1


def _channel_granularity(dtype):
    """Sublane-packing granularity for the second-to-last (channel) block dim."""
    itemsize = jnp.dtype(dtype).itemsize
    if itemsize >= 4:
        return 8
    if itemsize == 2:
        return 16
    return 32


def _need_bytes(block_elems, itemsize):
    # 2x-in + 2x-out double buffers in input dtype, plus the f32 temporaries
    # the kernel materializes (upcast, square, pre-cast result).
    return 4 * block_elems * itemsize + 3 * block_elems * 4


def _vmem_limit(need_bytes, vmem_cap):
    return int(min(max(need_bytes + (4 << 20), 32 << 20), (vmem_cap * 3) // 4))


def _check_c_tile(c, c_tile, gran):
    assert c % c_tile == 0, "c_tile must divide C"
    assert c_tile == c or c_tile % gran == 0, (
        f"c_tile must be a multiple of {gran} for this dtype (or equal C)")


def _smallest_c_tile(c, gran):
    return gran if (c % gran == 0 and gran <= c) else c


def _pick_c_tile(n, c, hw, dtype, budget_bytes, num_cores):
    """Channel tile for the single-pass kernel; None if nothing fits VMEM."""
    itemsize = jnp.dtype(dtype).itemsize
    gran = _channel_granularity(dtype)
    candidates = sorted({t for t in range(gran, c, gran) if c % t == 0} | {c})
    fitting = [t for t in candidates
               if _need_bytes(n * t * hw, itemsize) <= budget_bytes]
    if not fitting:
        return None  # caller switches to the two-pass HW-tiled path
    # Cap block bytes ~8 MiB: HBM roofline saturates well below this, and
    # smaller blocks give more grid steps (pipelining + megacore sharding).
    capped = [t for t in fitting if n * t * hw * itemsize <= (8 << 20)] or [min(fitting)]
    # Prefer >= 2 steps per TensorCore so input DMA overlaps compute on every
    # step and both v7x cores stream.
    for min_steps in (2 * num_cores, 2):
        multi = [t for t in capped if c // t >= min_steps]
        if multi:
            return max(multi)
    return max(capped)


def _pick_hw_tile(n, c_tile, hw, dtype, budget_bytes):
    """HW tile (multiple of 128 dividing HW) for the two-pass path."""
    itemsize = jnp.dtype(dtype).itemsize
    cands = sorted({t for t in range(128, hw, 128) if hw % t == 0}
                   | ({hw} if hw % 128 == 0 else set()))
    if not cands:
        # TODO(synk): HW not a multiple of 128; fall back to a single
        # (possibly oversized) HW block rather than padding.
        return hw
    fitting = [t for t in cands if _need_bytes(n * c_tile * t, itemsize) <= budget_bytes]
    if not fitting:
        return min(cands)
    capped = [t for t in fitting if n * c_tile * t * itemsize <= (8 << 20)] or [min(fitting)]
    multi = [t for t in capped if hw // t >= 2]
    return max(multi) if multi else max(capped)


# ----------------------------------------------------------------------------
# Wrapper
# ----------------------------------------------------------------------------
def ibnorm(x_nchw, gamma, beta, *, with_relu=False, c_tile=None, hw_tile=None,
           two_pass=None, donate_input=False):
    """IBNorm (+ optional fused ReLU).

    x_nchw: (N, C, H, W); gamma/beta: (C//2,). Returns (N, C, H, W).
    donate_input=True aliases x's buffer to the output (use when x is dead
    after normalization, as it is inside HRBranch's Conv2dIBNormRelu blocks).
    """
    n, c, h, w = x_nchw.shape
    cb = c // 2
    c_in = c - cb
    hw = h * w
    x3 = x_nchw.reshape(n, c, hw)
    dtype = x3.dtype
    itemsize = jnp.dtype(dtype).itemsize
    gran = _channel_granularity(dtype)

    # Pad gamma/beta to the full channel axis; the IN half of the pad is never
    # used (masked out by the per-channel select).
    gamma_full = jnp.concatenate(
        [gamma.astype(jnp.float32), jnp.ones((c_in,), jnp.float32)]).reshape(c, 1)
    beta_full = jnp.concatenate(
        [beta.astype(jnp.float32), jnp.zeros((c_in,), jnp.float32)]).reshape(c, 1)

    vmem_cap = _vmem_capacity_bytes()
    budget = vmem_cap // 2
    num_cores = _num_tensorcores()

    auto_c_tile = _pick_c_tile(n, c, hw, dtype, budget, num_cores)
    if two_pass is None:
        two_pass = auto_c_tile is None
    aliases = {0: 0} if donate_input else {}

    if not two_pass:
        # ------------------ single-pass fused path ------------------------
        if c_tile is None:
            c_tile = auto_c_tile if auto_c_tile is not None else _smallest_c_tile(c, gran)
        _check_c_tile(c, c_tile, gran)
        grid = (c // c_tile,)
        vmem_limit = _vmem_limit(_need_bytes(n * c_tile * hw, itemsize), vmem_cap)
        kernel = functools.partial(_ibnorm_kernel, bn_channels=cb, with_relu=with_relu)

        out3 = pl.pallas_call(
            kernel,
            out_shape=jax.ShapeDtypeStruct((n, c, hw), dtype),
            grid=grid,
            in_specs=[
                pl.BlockSpec((n, c_tile, hw), lambda i: (0, i, 0)),
                pl.BlockSpec((c_tile, 1), lambda i: (i, 0)),
                pl.BlockSpec((c_tile, 1), lambda i: (i, 0)),
            ],
            out_specs=pl.BlockSpec((n, c_tile, hw), lambda i: (0, i, 0)),
            input_output_aliases=aliases,
            compiler_params=pltpu.CompilerParams(
                dimension_semantics=("parallel",),
                vmem_limit_bytes=vmem_limit,
            ),
        )(x3, gamma_full, beta_full)
        return out3.reshape(n, c, h, w)

    # ---------------- two-pass (HW-tiled) fallback path --------------------
    if c_tile is None:
        c_tile = _smallest_c_tile(c, gran)
    _check_c_tile(c, c_tile, gran)
    if hw_tile is None:
        hw_tile = _pick_hw_tile(n, c_tile, hw, dtype, budget)
    assert hw % hw_tile == 0 and (hw_tile % 128 == 0 or hw_tile == hw), (
        "hw_tile must divide H*W and be a multiple of 128 (or equal H*W)")

    c_blocks = c // c_tile
    hw_blocks = hw // hw_tile
    vmem_limit = _vmem_limit(_need_bytes(n * c_tile * hw_tile, itemsize), vmem_cap)

    # Pass 1: sum / sum-of-squares accumulation (reduction axis last).
    s1, s2 = pl.pallas_call(
        _stats_kernel,
        out_shape=(jax.ShapeDtypeStruct((n, c, 1), jnp.float32),
                   jax.ShapeDtypeStruct((n, c, 1), jnp.float32)),
        grid=(c_blocks, hw_blocks),
        in_specs=[pl.BlockSpec((n, c_tile, hw_tile), lambda ci, hi: (0, ci, hi))],
        out_specs=[pl.BlockSpec((n, c_tile, 1), lambda ci, hi: (0, ci, 0)),
                   pl.BlockSpec((n, c_tile, 1), lambda ci, hi: (0, ci, 0))],
        compiler_params=pltpu.CompilerParams(
            dimension_semantics=("parallel", "arbitrary"),
            vmem_limit_bytes=vmem_limit,
        ),
    )(x3)

    # Tiny (N, C, 1) stats -> per-(n, c) scale/shift in plain JAX (negligible).
    inv_hw = jnp.float32(1.0 / hw)
    inv_nhw = jnp.float32(1.0 / (n * hw))
    mean_in = s1 * inv_hw
    var_in = jnp.maximum(s2 * inv_hw - mean_in * mean_in, 0.0)
    scale_in = jax.lax.rsqrt(var_in + EPS)
    shift_in = -mean_in * scale_in
    mean_bn = jnp.sum(s1, axis=0, keepdims=True) * inv_nhw
    var_bn = jnp.maximum(
        jnp.sum(s2, axis=0, keepdims=True) * inv_nhw - mean_bn * mean_bn, 0.0)
    g = gamma_full.reshape(1, c, 1)
    b = beta_full.reshape(1, c, 1)
    scale_bn = jax.lax.rsqrt(var_bn + EPS) * g
    shift_bn = b - mean_bn * scale_bn
    is_bn = jnp.arange(c).reshape(1, c, 1) < cb
    scale = jnp.broadcast_to(jnp.where(is_bn, scale_bn, scale_in), (n, c, 1))
    shift = jnp.broadcast_to(jnp.where(is_bn, shift_bn, shift_in), (n, c, 1))
    scale = scale.astype(jnp.float32)
    shift = shift.astype(jnp.float32)

    # Pass 2: normalize (+ ReLU), fully tiled over channels and HW.
    norm_kernel = functools.partial(_normalize_kernel, with_relu=with_relu)
    out3 = pl.pallas_call(
        norm_kernel,
        out_shape=jax.ShapeDtypeStruct((n, c, hw), dtype),
        grid=(c_blocks, hw_blocks),
        in_specs=[
            pl.BlockSpec((n, c_tile, hw_tile), lambda ci, hi: (0, ci, hi)),
            pl.BlockSpec((n, c_tile, 1), lambda ci, hi: (0, ci, 0)),
            pl.BlockSpec((n, c_tile, 1), lambda ci, hi: (0, ci, 0)),
        ],
        out_specs=pl.BlockSpec((n, c_tile, hw_tile), lambda ci, hi: (0, ci, hi)),
        input_output_aliases=aliases,
        compiler_params=pltpu.CompilerParams(
            dimension_semantics=("parallel", "parallel"),
            vmem_limit_bytes=vmem_limit,
        ),
    )(x3, scale, shift)
    return out3.reshape(n, c, h, w)


# ----------------------------------------------------------------------------
# Pure-JAX reference (PyTorch training-mode semantics)
# ----------------------------------------------------------------------------
def _ibnorm_ref(x, gamma, beta):
    n, c, h, w = x.shape
    cb = c // 2
    x_bn, x_in = x[:, :cb], x[:, cb:]
    m = jnp.mean(x_bn, axis=(0, 2, 3), keepdims=True)
    v = jnp.mean((x_bn - m) ** 2, axis=(0, 2, 3), keepdims=True)
    bn = (x_bn - m) / jnp.sqrt(v + EPS) * gamma.reshape(1, cb, 1, 1) + beta.reshape(
        1, cb, 1, 1)
    mi = jnp.mean(x_in, axis=(2, 3), keepdims=True)
    vi = jnp.mean((x_in - mi) ** 2, axis=(2, 3), keepdims=True)
    inn = (x_in - mi) / jnp.sqrt(vi + EPS)
    return jnp.concatenate([bn, inn], axis=1)


if __name__ == "__main__":
    key = jax.random.PRNGKey(0)
    k1, k2, k3, k4 = jax.random.split(key, 4)

    # Case 1: C=4 -> BN/IN boundary inside the single channel tile; no ReLU;
    # input buffer donated (x not used after the call; ref computed first).
    N, C, H, W = 2, 4, 16, 16
    x = jax.random.normal(k1, (N, C, H, W), dtype=jnp.float32)
    gamma = 1.0 + 0.1 * jax.random.normal(k2, (C // 2,), dtype=jnp.float32)
    beta = 0.1 * jax.random.normal(k3, (C // 2,), dtype=jnp.float32)

    ref = jax.block_until_ready(_ibnorm_ref(x, gamma, beta))
    out = jax.block_until_ready(
        ibnorm(x, gamma, beta, with_relu=False, donate_input=True))
    assert out.shape == (N, C, H, W)
    assert jnp.allclose(out, ref, atol=1e-4, rtol=1e-4), "mismatch (case 1)"

    # Case 2: channel-tiled multi-step grid (c_tile=8, grid=(2,)) with the
    # fused ReLU — the Conv2dIBNormRelu configuration.
    N2, C2, H2, W2 = 2, 16, 16, 16
    x2 = jax.random.normal(k4, (N2, C2, H2, W2), dtype=jnp.float32)
    gamma2 = jnp.linspace(0.5, 1.5, C2 // 2, dtype=jnp.float32)
    beta2 = jnp.linspace(-0.2, 0.2, C2 // 2, dtype=jnp.float32)

    ref2 = jax.block_until_ready(jnp.maximum(_ibnorm_ref(x2, gamma2, beta2), 0.0))
    out2 = jax.block_until_ready(
        ibnorm(x2, gamma2, beta2, with_relu=True, c_tile=8))
    assert out2.shape == (N2, C2, H2, W2)
    assert jnp.allclose(out2, ref2, atol=1e-4, rtol=1e-4), "mismatch (case 2)"

    # Case 3: forced two-pass fallback (HW-tiled stats accumulation + tiled
    # normalize) — the path used when a full-HW channel block exceeds VMEM.
    out3 = jax.block_until_ready(
        ibnorm(x2, gamma2, beta2, with_relu=True, two_pass=True,
               c_tile=8, hw_tile=128))
    assert out3.shape == (N2, C2, H2, W2)
    assert jnp.allclose(out3, ref2, atol=1e-4, rtol=1e-4), "mismatch (case 3)"

    print("KERNEL_OK")
</pallas_src>

<mosaic_0001>
module attributes {stable_mosaic.version = 11 : i64} {
  func.func @_ibnorm_kernel(%arg0: i32, %arg1: memref<2x4x256xf32, #tpu.memory_space<vmem>>, %arg2: memref<4x1xf32, #tpu.memory_space<vmem>>, %arg3: memref<4x1xf32, #tpu.memory_space<vmem>>, %arg4: memref<2x4x256xf32, #tpu.memory_space<vmem>>) attributes {dimension_semantics = [#tpu.dimension_semantics<parallel>], iteration_bounds = array<i64: 1>, scalar_prefetch = 0 : i64, scratch_operands = 0 : i64, tpu.core_type = #tpu.core_type<tc>, window_params = [{transform_indices = @transform_0, window_bounds = array<i64: 2, 4, 256>}, {transform_indices = @transform_1, window_bounds = array<i64: 4, 1>}, {transform_indices = @transform_2, window_bounds = array<i64: 4, 1>}, {transform_indices = @transform_3, window_bounds = array<i64: 2, 4, 256>}]} {
    %c0 = arith.constant 0 : index
    %c0_0 = arith.constant 0 : index
    %c0_1 = arith.constant 0 : index
    %0 = vector.load %arg1[%c0, %c0_0, %c0_1] : memref<2x4x256xf32, #tpu.memory_space<vmem>>, vector<2x4x256xf32>
    %cst = arith.constant dense<0.000000e+00> : vector<2x4xf32>
    %1 = vector.multi_reduction <add>, %0, %cst [2] : vector<2x4x256xf32> to vector<2x4xf32>
    %2 = vector.shape_cast %1 : vector<2x4xf32> to vector<2x4x1xf32>
    %3 = arith.mulf %0, %0 : vector<2x4x256xf32>
    %cst_2 = arith.constant dense<0.000000e+00> : vector<2x4xf32>
    %4 = vector.multi_reduction <add>, %3, %cst_2 [2] : vector<2x4x256xf32> to vector<2x4xf32>
    %5 = vector.shape_cast %4 : vector<2x4xf32> to vector<2x4x1xf32>
    %cst_3 = arith.constant 3.906250e-03 : f32
    %6 = vector.broadcast %cst_3 : f32 to vector<2x4x1xf32>
    %7 = arith.mulf %2, %6 : vector<2x4x1xf32>
    %cst_4 = arith.constant 3.906250e-03 : f32
    %8 = vector.broadcast %cst_4 : f32 to vector<2x4x1xf32>
    %9 = arith.mulf %5, %8 : vector<2x4x1xf32>
    %10 = arith.mulf %7, %7 : vector<2x4x1xf32>
    %11 = arith.subf %9, %10 : vector<2x4x1xf32>
    %cst_5 = arith.constant 0.000000e+00 : f32
    %12 = vector.broadcast %cst_5 : f32 to vector<2x4x1xf32>
    %13 = arith.maximumf %11, %12 : vector<2x4x1xf32>
    %cst_6 = arith.constant 9.99999974E-6 : f32
    %14 = vector.broadcast %cst_6 : f32 to vector<2x4x1xf32>
    %15 = arith.addf %13, %14 : vector<2x4x1xf32>
    %16 = math.rsqrt %15 : vector<2x4x1xf32>
    %cst_7 = arith.constant 0.000000e+00 : f32
    %17 = vector.broadcast %cst_7 : f32 to vector<2x4x1xf32>
    %18 = arith.subf %17, %7 : vector<2x4x1xf32>
    %19 = arith.mulf %18, %16 : vector<2x4x1xf32>
    %cst_8 = arith.constant dense<0.000000e+00> : vector<4x1xf32>
    %20 = vector.multi_reduction <add>, %2, %cst_8 [0] : vector<2x4x1xf32> to vector<4x1xf32>
    %21 = vector.shape_cast %20 : vector<4x1xf32> to vector<1x4x1xf32>
    %cst_9 = arith.constant dense<0.000000e+00> : vector<4x1xf32>
    %22 = vector.multi_reduction <add>, %5, %cst_9 [0] : vector<2x4x1xf32> to vector<4x1xf32>
    %23 = vector.shape_cast %22 : vector<4x1xf32> to vector<1x4x1xf32>
    %cst_10 = arith.constant 0.001953125 : f32
    %24 = vector.broadcast %cst_10 : f32 to vector<1x4x1xf32>
    %25 = arith.mulf %21, %24 : vector<1x4x1xf32>
    %cst_11 = arith.constant 0.001953125 : f32
    %26 = vector.broadcast %cst_11 : f32 to vector<1x4x1xf32>
    %27 = arith.mulf %23, %26 : vector<1x4x1xf32>
    %28 = arith.mulf %25, %25 : vector<1x4x1xf32>
    %29 = arith.subf %27, %28 : vector<1x4x1xf32>
    %cst_12 = arith.constant 0.000000e+00 : f32
    %30 = vector.broadcast %cst_12 : f32 to vector<1x4x1xf32>
    %31 = arith.maximumf %29, %30 : vector<1x4x1xf32>
    %c0_13 = arith.constant 0 : index
    %c0_14 = arith.constant 0 : index
    %32 = vector.load %arg2[%c0_13, %c0_14] : memref<4x1xf32, #tpu.memory_space<vmem>>, vector<4x1xf32>
    %33 = vector.shape_cast %32 : vector<4x1xf32> to vector<1x4x1xf32>
    %c0_15 = arith.constant 0 : index
    %c0_16 = arith.constant 0 : index
    %34 = vector.load %arg3[%c0_15, %c0_16] : memref<4x1xf32, #tpu.memory_space<vmem>>, vector<4x1xf32>
    %35 = vector.shape_cast %34 : vector<4x1xf32> to vector<1x4x1xf32>
    %cst_17 = arith.constant 9.99999974E-6 : f32
    %36 = vector.broadcast %cst_17 : f32 to vector<1x4x1xf32>
    %37 = arith.addf %31, %36 : vector<1x4x1xf32>
    %38 = math.rsqrt %37 : vector<1x4x1xf32>
    %39 = arith.mulf %38, %33 : vector<1x4x1xf32>
    %40 = arith.mulf %25, %39 : vector<1x4x1xf32>
    %41 = arith.subf %35, %40 : vector<1x4x1xf32>
    %c4_i32 = arith.constant 4 : i32
    %42 = arith.muli %arg0, %c4_i32 : i32
    %43 = tpu.iota {dimensions = array<i32: 1>} : vector<1x4x1xi32>
    %44 = vector.broadcast %42 : i32 to vector<1x4x1xi32>
    %45 = arith.addi %43, %44 : vector<1x4x1xi32>
    %c2_i32 = arith.constant 2 : i32
    %46 = vector.broadcast %c2_i32 : i32 to vector<1x4x1xi32>
    %47 = arith.cmpi slt, %45, %46 : vector<1x4x1xi32>
    %48 = vector.shape_cast %47 : vector<1x4x1xi1> to vector<1x4x1xi1>
    %49 = vector.broadcast %48 : vector<1x4x1xi1> to vector<2x4x1xi1>
    %50 = vector.shape_cast %39 : vector<1x4x1xf32> to vector<1x4x1xf32>
    %51 = vector.broadcast %50 : vector<1x4x1xf32> to vector<2x4x1xf32>
    %52 = arith.select %49, %51, %16 : vector<2x4x1xi1>, vector<2x4x1xf32>
    %53 = vector.shape_cast %47 : vector<1x4x1xi1> to vector<1x4x1xi1>
    %54 = vector.broadcast %53 : vector<1x4x1xi1> to vector<2x4x1xi1>
    %55 = vector.shape_cast %41 : vector<1x4x1xf32> to vector<1x4x1xf32>
    %56 = vector.broadcast %55 : vector<1x4x1xf32> to vector<2x4x1xf32>
    %57 = arith.select %54, %56, %19 : vector<2x4x1xi1>, vector<2x4x1xf32>
    %58 = vector.broadcast %52 : vector<2x4x1xf32> to vector<2x4x256xf32>
    %59 = arith.mulf %0, %58 : vector<2x4x256xf32>
    %60 = vector.broadcast %57 : vector<2x4x1xf32> to vector<2x4x256xf32>
    %61 = arith.addf %59, %60 : vector<2x4x256xf32>
    %c0_18 = arith.constant 0 : index
    %c0_19 = arith.constant 0 : index
    %c0_20 = arith.constant 0 : index
    %62 = vector.load %arg4[%c0_18, %c0_19, %c0_20] : memref<2x4x256xf32, #tpu.memory_space<vmem>>, vector<2x4x256xf32>
    tpu.vector_store %arg4[%c0_18, %c0_19, %c0_20], %61 {strides = array<i32>} : memref<2x4x256xf32, #tpu.memory_space<vmem>>, vector<2x4x256xf32>,
    return
  }
  func.func @transform_0(%arg0: i32) -> (i32, i32, i32) {
    %c0_i32 = arith.constant 0 : i32
    %c0_i32_0 = arith.constant 0 : i32
    %c0_i32_1 = arith.constant 0 : i32
    return %c0_i32, %arg0, %c0_i32_0 : i32, i32, i32
  }
  func.func @transform_1(%arg0: i32) -> (i32, i32) {
    %c0_i32 = arith.constant 0 : i32
    %c0_i32_0 = arith.constant 0 : i32
    return %arg0, %c0_i32 : i32, i32
  }
  func.func @transform_2(%arg0: i32) -> (i32, i32) {
    %c0_i32 = arith.constant 0 : i32
    %c0_i32_0 = arith.constant 0 : i32
    return %arg0, %c0_i32 : i32, i32
  }
  func.func @transform_3(%arg0: i32) -> (i32, i32, i32) {
    %c0_i32 = arith.constant 0 : i32
    %c0_i32_0 = arith.constant 0 : i32
    %c0_i32_1 = arith.constant 0 : i32
    return %c0_i32, %arg0, %c0_i32_0 : i32, i32, i32
  }
}

</mosaic_0001>

<bundles_post_ra>
// kernel: tpu_custom_call.1
= control target key start
LH: loop header
LB: loop body
LE: loop exit
PB: predicated region body
PF: predicated region fallthrough
CT: control target
= control target key end

     0   :  { %8 = vsyncpa [#allocation3], 0  ;;  %s367_s0 = inlined_call_operand.hbm [shape: f32[2,4,256], index: 0, kind: input, shape index: {}, may-alias: {0,3}]   ;;  %s368_s1 = inlined_call_operand.vmem [shape: f32[4,1], index: 1, kind: input, shape index: {}]   ;;  %s369_s2 = inlined_call_operand.vmem [shape: f32[4,1], index: 2, kind: input, shape index: {}]   ;;  %s370_s3 = inlined_call_operand.hbm [shape: f32[2,4,256], index: 3, kind: output, shape index: {}, may-alias: {0,3}]  }
   0x1   :  { %9 = vsyncpa [#allocation4], 0  ;;  %s14_s14 = sshll.u32 %s367_s0, 4  ;;  %s285_s15 = smov [#allocation2]   ;;  %s15_s14 = int_to_ptr.hbm [resolvable:$true] %s14_s14 }
   0x2   :  { %s16_s16 = sshll.u32 %s285_s15, 4  ;;  %s286_s17 = smov 128   ;;  %s17_s16 = int_to_ptr.vmem [resolvable:$true] %s16_s16 }
   0x3   :  { %s287_s18 = smov 8  }
   0x4   :  { %22 = dma.hbm_to_vmem [thread:$0]  %s15_s14, 256, %s17_s16, [#allocation3], %s286_s17, %s286_s17, %s287_s18  }
   0x5   :  { %281 = dma.done.wait [#allocation3], 256  }
   0x6   :  { %282 = vsyncadd [#allocation3], 4294967040  ;;  %v317_v0 = vld [vmem:[#allocation2] sm:$0xff]  ;;  %v319_v1 = vld [vmem:[#allocation2 + $0x8] sm:$0xff]  ;;  %vm46_vm0 = vcmask 1043456   ;;  %v288_v27 = vmov 0  }
   0x7   :  { %35 = vst [vmem:[#allocation1] ss:$2 sm:$0xff] %v317_v0  ;;  %v57_v2 = vmul.f32 %v317_v0, %v317_v0  ;;  %v58_v3 = vmul.f32 %v319_v1, %v319_v1  ;;  %224 = vset.pattern.permute.xlu2 %v288_v27  ;;  %226 = vset.pattern.permute.xlu1 %v288_v27  ;;  %s205_s24 = sshll.u32 %s370_s3, 4  ;;  %s206_s24 = int_to_ptr.hbm [resolvable:$true] %s205_s24 }
   0x8   :  { %39 = vst [vmem:[#allocation1 + $0x10] ss:$2 sm:$0xff] %v319_v1  ;;  %225 = vset.pattern.permute.xlu0 %v288_v27 }
   0xe   :  { %v36_v4 = vld.sshfl [vmem:[#allocation1] sm:$0xff pattern:$0x75316420]  ;;  %v37_v5 = vld.sshfl [vmem:[#allocation1 + $0x8] sm:$0xff pattern:$0x75316420] }
   0xf   :  { %v47_v6 = vsel %vm46_vm0, %v36_v4, 0.0  ;;  %v48_v7 = vsel %vm46_vm0, %v37_v5, 0.0  ;;  %61 = vst [vmem:[#allocation1] ss:$2 sm:$0xff] %v57_v2  ;;  %v146_v2 = vlaneseq }
  0x10   :  { %v49_v8 = vadd.f32 %v48_v7, %v47_v6  ;;  %v40_v9 = vld.sshfl [vmem:[#allocation1 + $0x10] sm:$0xff pattern:$0x75316420]  ;;  %v41_v10 = vld.sshfl [vmem:[#allocation1 + $0x18] sm:$0xff pattern:$0x75316420] }
  0x11   :  { %65 = vst [vmem:[#allocation1 + $0x10] ss:$2 sm:$0xff] %v58_v3  ;;  %v52_v11 = vsel %vm46_vm0, %v40_v9, 0.0  ;;  %v53_v12 = vsel %vm46_vm0, %v41_v10, 0.0  ;;  %v147_v7 = vshrl.u32 %v146_v2, 7 }
  0x12   :  { %50 = vadd.xlane.f32.xlu0 %v49_v8  ;;  %v54_v15 = vadd.f32 %v53_v12, %v52_v11  ;;  %v129_v9 = vld [vmem:[%s368_s1] sm:$0xf]  ;;  %s290_s1 = smov [#allocation5]  }
  0x13   :  { %vm150_vm9 = vcmp.lt.s32.totalorder %v147_v7, 2 }
  0x16   :  { %v62_v13 = vld.sshfl [vmem:[#allocation1] sm:$0xff pattern:$0x75316420]  ;;  %v63_v14 = vld.sshfl [vmem:[#allocation1 + $0x8] sm:$0xff pattern:$0x75316420] }
  0x17   :  { %v72_v16 = vsel %vm46_vm0, %v62_v13, 0.0  ;;  %v73_v17 = vsel %vm46_vm0, %v63_v14, 0.0 }
  0x18   :  { %v74_v18 = vadd.f32 %v73_v17, %v72_v16  ;;  %v66_v19 = vld.sshfl [vmem:[#allocation1 + $0x10] sm:$0xff pattern:$0x75316420]  ;;  %v67_v20 = vld.sshfl [vmem:[#allocation1 + $0x18] sm:$0xff pattern:$0x75316420] }
  0x19   :  { %v77_v21 = vsel %vm46_vm0, %v66_v19, 0.0  ;;  %v78_v22 = vsel %vm46_vm0, %v67_v20, 0.0  ;;  %v130_v16 = vld [vmem:[%s369_s2] sm:$0xf]  ;;  %s203_s2 = sshll.u32 %s290_s1, 4  ;;  %s204_s2 = int_to_ptr.vmem [resolvable:$true] %s203_s2 }
  0x1a   :  { %75 = vadd.xlane.f32.xlu1 %v74_v18  ;;  %55 = vadd.xlane.f32.xlu0 %v54_v15  ;;  %v79_v23 = vadd.f32 %v78_v22, %v77_v21 }
  0x22   :  { %80 = vadd.xlane.f32.xlu1 %v79_v23 }
  0x85   :  { %v51_v24 = vpop.xlane.xlu0 %50 }
  0x86   :  { %v335_v25 = vmul.f32 0.00390625, %v51_v24  ;;  %v118_v32 = vsel %vm46_vm0, %v51_v24, 0.0 }
  0x88   :  { %v86_v26 = vmul.f32 %v335_v25, %v335_v25  ;;  %v114_v17 = vsub.f32 0.0, %v335_v25  ;;  %v289_v25 = vmov 839922192  }
  0x8d   :  { %v76_v28 = vpop.xlane.xlu1 %75  ;;  %v56_v29 = vpop.xlane.xlu0 %55 }
  0x8e   :  { %v84_v30 = vmul.f32 0.00390625, %v76_v28  ;;  %v119_v31 = vsel %vm46_vm0, %v56_v29, 0.0  ;;  %v341_v34 = vmul.f32 0.00390625, %v56_v29  ;;  %v121_v41 = vsel %vm46_vm0, %v76_v28, 0.0 }
  0x8f   :  { %v120_v35 = vadd.f32 %v119_v31, %v118_v32  ;;  %v166_v29 = vunpack.c.l.s4 %v289_v25 }
  0x90   :  { %v88_v33 = vsub.f32 %v84_v30, %v86_v26  ;;  %v87_v38 = vmul.f32 %v341_v34, %v341_v34  ;;  %v115_v18 = vsub.f32 0.0, %v341_v34 }
  0x91   :  { %v124_v39 = vmul.f32 0.001953125, %v120_v35  ;;  %v167_v30 = vunpack.c.0.s8 %v166_v29 }
  0x92   :  { %v90_v36 = vmax.f32 %v88_v33, 0.0 }
  0x93   :  { %v126_v46 = vmul.f32 %v124_v39, %v124_v39 }
  0x94   :  { %v92_v37 = vadd.f32 1e-05, %v90_v36 }
  0x95   :  { %v81_v40 = vpop.xlane.xlu1 %80 }
  0x96   :  { %v85_v42 = vmul.f32 0.00390625, %v81_v40  ;;  %v122_v43 = vsel %vm46_vm0, %v81_v40, 0.0  ;;  %227 = vrsqrt.f32 %v92_v37  ;;  %vm100_vm5 = vweird.f32 %v92_v37 }
  0x97   :  { %v123_v44 = vadd.f32 %v122_v43, %v121_v41 }
  0x98   :  { %v89_v45 = vsub.f32 %v85_v42, %v87_v38 }
  0x99   :  { %v125_v47 = vmul.f32 0.001953125, %v123_v44 }
  0x9a   :  { %v91_v48 = vmax.f32 %v89_v45, 0.0 }
  0x9b   :  { %v127_v49 = vsub.f32 %v125_v47, %v126_v46 }
  0x9c   :  { %v93_v50 = vadd.f32 1e-05, %v91_v48  ;;  %v228_v51 = vpop.eup %227 }
  0x9d   :  { %v128_v52 = vmax.f32 %v127_v49, 0.0  ;;  %v95_v54 = vmul.f32 %v228_v51, %v92_v37  ;;  %vm101_vm2 = vweird.f32 %v228_v51 }
  0x9e   :  { %229 = vrsqrt.f32 %v93_v50  ;;  %vm110_vm7 = vweird.f32 %v93_v50  ;;  %vm102_vm8 = vmor %vm100_vm5, %vm101_vm2 }
  0x9f   :  { %v131_v53 = vadd.f32 1e-05, %v128_v52  ;;  %v96_v56 = vmul.f32 %v228_v51, %v95_v54 }
  0xa1   :  { %231 = vrsqrt.f32 %v131_v53  ;;  %v97_v61 = vmul.f32 0.5, %v96_v56  ;;  %vm138_vm3 = vweird.f32 %v131_v53 }
  0xa3   :  { %v98_v4 = vsub.f32 1.5, %v97_v61 }
  0xa4   :  { %v230_v55 = vpop.eup %229 }
  0xa5   :  { %v105_v57 = vmul.f32 %v230_v55, %v93_v50  ;;  %v99_v8 = vmul.f32 %v228_v51, %v98_v4  ;;  %vm111_vm4 = vweird.f32 %v230_v55 }
  0xa6   :  { %vm112_vm10 = vmor %vm110_vm7, %vm111_vm4 }
  0xa7   :  { %v232_v58 = vpop.eup %231  ;;  %v106_v59 = vmul.f32 %v230_v55, %v105_v57  ;;  %v103_v14 = vsel %vm102_vm8, %v228_v51, %v99_v8 }
  0xa8   :  { %v133_v60 = vmul.f32 %v232_v58, %v131_v53  ;;  %vm139_vm1 = vweird.f32 %v232_v58  ;;  %v116_v21 = vmul.f32 %v114_v17, %v103_v14 }
  0xa9   :  { %v107_v62 = vmul.f32 0.5, %v106_v59  ;;  %vm140_vm6 = vmor %vm138_vm3, %vm139_vm1 }
  0xaa   :  { %v134_v63 = vmul.f32 %v232_v58, %v133_v60 }
  0xab   :  { %v108_v3 = vsub.f32 1.5, %v107_v62 }
  0xac   :  { %v135_v5 = vmul.f32 0.5, %v134_v63 }
  0xad   :  { %v109_v11 = vmul.f32 %v230_v55, %v108_v3 }
  0xae   :  { %v136_v6 = vsub.f32 1.5, %v135_v5 }
  0xaf   :  { %v113_v15 = vsel %vm112_vm10, %v230_v55, %v109_v11 }
  0xb0   :  { %v137_v10 = vmul.f32 %v232_v58, %v136_v6  ;;  %v117_v22 = vmul.f32 %v115_v18, %v113_v15 }
  0xb2   :  { %v141_v12 = vsel %vm140_vm6, %v232_v58, %v137_v10 }
  0xb3   :  { %v142_v13 = vmul.f32 %v141_v12, %v129_v9 }
  0xb5   :  { %v153_v19 = vsel %vm150_vm9, %v142_v13, %v103_v14  ;;  %v143_v20 = vmul.f32 %v142_v13, %v124_v39  ;;  %v154_v27 = vsel %vm150_vm9, %v142_v13, %v113_v15 }
  0xb6   :  { %159 = vperm.xlu2 %224, %v153_v19  }
  0xb7   :  { %v144_v23 = vsub.f32 %v130_v16, %v143_v20 }
  0xb9   :  { %v156_v24 = vsel %vm150_vm9, %v144_v23, %v117_v22  ;;  %v155_v26 = vsel %vm150_vm9, %v144_v23, %v116_v21 }
  0xba   :  { %183 = vperm.xlu1 %226, %v156_v24   ;;  %179 = vperm.xlu0 %225, %v155_v26  }
  0xbe   :  { %163 = vperm.xlu2 %224, %v154_v27  }
 0x110   :  { %v160_v28 = vpop.permute.xlu2 %159 }
 0x111   :  { %v168_v32 = vperm.slane %v160_v28, %v167_v30 }
 0x113   :  { %v175_v36 = vmul.f32 %v168_v32, %v317_v0 }
 0x118   :  { %v164_v31 = vpop.permute.xlu2 %163 }
 0x119   :  { %v172_v33 = vperm.slane %v164_v31, %v167_v30 }
 0x11b   :  { %v176_v37 = vmul.f32 %v172_v33, %v319_v1 }
 0x12c   :  { %v184_v34 = vpop.permute.xlu1 %183  ;;  %v180_v35 = vpop.permute.xlu0 %179 }
 0x12d   :  { %v192_v38 = vperm.slane %v184_v34, %v167_v30  ;;  %v188_v39 = vperm.slane %v180_v35, %v167_v30 }
 0x12f   :  { %v196_v40 = vadd.f32 %v192_v38, %v176_v37  ;;  %v195_v41 = vadd.f32 %v188_v39, %v175_v36 }
 0x131   :  { %198 = vst [vmem:[#allocation5 + $0x8] sm:$0xff] %v196_v40 }
 0x132   :  { %197 = vst [vmem:[#allocation5] sm:$0xff] %v195_v41 }
 0x133   :  { %211 = dma.vmem_to_hbm [thread:$0]  %s204_s2, 256, %s206_s24, [#allocation4], %s286_s17, %s286_s17, %s287_s18  }
 0x134   :  { %283 = dma.done.wait [#allocation4], 256  }
 0x135   :  { %284 = vsyncadd [#allocation4], 4294967040 }
 0x136   :  { %216 = vsyncpa [#allocation3], 1 }
 0x137   :  { %217 = vsyncpa [#allocation4], 1 }

</bundles_post_ra>
